<compile_context>
chip_gen: v7x
topology: tpu7x:2x2x1
jax: 0.10.0
libtpu: 0.0.40
codegen_flags: <defaults>
</compile_context>

<pallas_src>
import jax
import jax.numpy as jnp
from jax.experimental import pallas as pl
from jax.experimental.pallas import tpu as pltpu

_LANES = 128
_SUBLANES = 8


def _temp_scale_kernel(inv_temp_ref, x_ref, o_ref):
    # inv_temp_ref: scalar-prefetch SMEM ref, shape (1,), float32 == 1/T
    # x_ref / o_ref: VMEM tiles of the 2D logits view
    inv = inv_temp_ref[0]
    o_ref[...] = (x_ref[...].astype(jnp.float32) * inv).astype(o_ref.dtype)


def _ceil_to(x, m):
    return ((x + m - 1) // m) * m


def _pick_blocks(rows, cols, itemsize, block_bytes):
    """Choose a (row_block, col_block) tile of roughly `block_bytes` bytes."""
    cols_pad = _ceil_to(cols, _LANES)  # VMEM footprint per row (lane padding)
    if cols_pad * _SUBLANES * itemsize <= block_bytes:
        # Full-width rows fit: block only the row (sublane) dimension.
        bc = cols
        row_budget = max(block_bytes // (cols_pad * itemsize), _SUBLANES)
        if rows <= row_budget:
            br = rows
            if rows >= 256:
                # Keep >=2 blocks so both of v7x's TensorCores get work.
                br = min(_ceil_to((rows + 1) // 2, 32), rows)
        else:
            br = max((row_budget // 32) * 32, 32)
    else:
        # Extremely wide last dim: block the lane dimension too.
        bc = max((block_bytes // (_SUBLANES * itemsize) // _LANES) * _LANES,
                 _LANES)
        br = min(rows, _SUBLANES)
    return br, bc


def temperature_scale(logits, temperature, *, block_bytes=4 << 20,
                      min_kernel_elements=64 * 1024, force_kernel=False,
                      donate_logits=False):
    """logits / temperature, implemented as multiply-by-reciprocal.

    Note: x * (1/T) is not bit-identical to x / T (~1-2 ulp in f32), which is
    fine for inference/calibration use.
    """
    orig_shape = logits.shape
    orig_dtype = logits.dtype
    itemsize = jnp.dtype(orig_dtype).itemsize

    total = 1
    for d in orig_shape:
        total *= d

    inv_temp = (jnp.float32(1.0) /
                jnp.asarray(temperature, dtype=jnp.float32)).reshape(1)

    if total == 0 or (total < min_kernel_elements and not force_kernel):
        # Too small to amortize a pallas_call launch + reshape round-trip;
        # let XLA fuse the scalar multiply into the surrounding graph.
        return (logits.astype(jnp.float32) * inv_temp[0]).astype(orig_dtype)

    # Free (no-copy, contiguous) 2D view of the logits:
    #   * lane-dense (rows, 128) when total is 128-divisible (common case),
    #   * (prod(leading dims), last_dim) otherwise -- Pallas masks the ragged
    #     edge blocks, so no pad/slice/concatenate copies are needed.
    if total % _LANES == 0:
        rows, cols = total // _LANES, _LANES
    else:
        cols = orig_shape[-1] if len(orig_shape) else 1
        rows = total // cols
    x2d = logits.reshape(rows, cols)

    br, bc = _pick_blocks(rows, cols, itemsize, block_bytes)
    grid = (pl.cdiv(rows, br), pl.cdiv(cols, bc))

    out2d = pl.pallas_call(
        _temp_scale_kernel,
        out_shape=jax.ShapeDtypeStruct((rows, cols), orig_dtype),
        grid_spec=pltpu.PrefetchScalarGridSpec(
            num_scalar_prefetch=1,
            grid=grid,
            in_specs=[pl.BlockSpec((br, bc), lambda i, j, inv: (i, j))],
            out_specs=pl.BlockSpec((br, bc), lambda i, j, inv: (i, j)),
        ),
        # x2d is flat input index 1 (after the scalar-prefetch arg); alias it
        # to the output only when the caller can donate the logits buffer --
        # otherwise XLA inserts a defensive copy, which hurts this
        # bandwidth-bound kernel.
        input_output_aliases={1: 0} if donate_logits else {},
        compiler_params=pltpu.CompilerParams(
            dimension_semantics=("parallel", "parallel"),
            vmem_limit_bytes=32 << 20),
    )(inv_temp, x2d)

    return out2d.reshape(orig_shape)


class ModelWithTemperature:
    """JAX/Pallas port of the PyTorch ModelWithTemperature wrapper."""

    def __init__(self, model=None, temperature=1.5):
        # nn.Parameter(torch.ones(1) * temperature)
        self.temperature = jnp.ones((1,), dtype=jnp.float32) * float(temperature)
        # TODO(synk): the wrapped classification model is arbitrary in the
        # original code; here it defaults to identity on pre-computed logits.
        self.model = model if model is not None else (lambda x: x)

    def __call__(self, x):
        logits = self.model(x)
        return self.temperature_scale(logits)

    def temperature_scale(self, logits):
        return temperature_scale(logits, self.temperature[0])

    # TODO(synk): set_temperature (LBFGS NLL tuning over data loaders) is a
    # host-side optimization loop with no Pallas equivalent; not ported.
    # TODO(synk): no custom_vjp on temperature_scale; jax.grad w.r.t. the
    # temperature (needed if NLL tuning is ever ported) would need
    # dx = g/T, dT = -sum(g*out)/T.


if __name__ == "__main__":
    key = jax.random.PRNGKey(0)
    # NCHW logits: batch=2, classes=4, spatial=16x16
    logits = jax.random.normal(key, (2, 4, 16, 16), dtype=jnp.float32)
    ref = logits / jnp.float32(1.5)

    m = ModelWithTemperature(temperature=1.5)

    # 1) Module forward: small logits take the fused plain-JAX fallback path.
    out = jax.block_until_ready(m(logits))
    assert out.shape == logits.shape and out.dtype == logits.dtype
    assert jnp.allclose(out, ref, atol=1e-6, rtol=1e-5)

    # 2) Exercise the Pallas kernel path (128-divisible total).
    out_k = jax.block_until_ready(
        temperature_scale(logits, m.temperature[0], force_kernel=True))
    assert out_k.shape == logits.shape and out_k.dtype == logits.dtype
    assert jnp.allclose(out_k, ref, atol=1e-6, rtol=1e-5)

    # 3) Exercise the ragged-total kernel path (total % 128 != 0) -- handled
    #    in-kernel via masked edge blocks, no extra HBM copies.
    logits_r = jax.random.normal(jax.random.PRNGKey(1), (2, 3, 9, 7),
                                 dtype=jnp.float32)
    out_r = jax.block_until_ready(
        temperature_scale(logits_r, 1.5, force_kernel=True))
    ref_r = logits_r / jnp.float32(1.5)
    assert out_r.shape == logits_r.shape and out_r.dtype == logits_r.dtype
    assert jnp.allclose(out_r, ref_r, atol=1e-6, rtol=1e-5)

    print("KERNEL_OK")
</pallas_src>

<mosaic_0001>
module attributes {stable_mosaic.version = 11 : i64} {
  func.func @_temp_scale_kernel(%arg0: i32, %arg1: i32, %arg2: memref<1xf32, #tpu.memory_space<smem>>, %arg3: memref<16x128xf32, #tpu.memory_space<vmem>>, %arg4: memref<16x128xf32, #tpu.memory_space<vmem>>) attributes {dimension_semantics = [#tpu.dimension_semantics<parallel>, #tpu.dimension_semantics<parallel>], iteration_bounds = array<i64: 1, 1>, scalar_prefetch = 1 : i64, scratch_operands = 0 : i64, tpu.core_type = #tpu.core_type<tc>, window_params = [{transform_indices = @transform_0, window_bounds = array<i64: 16, 128>}, {transform_indices = @transform_1, window_bounds = array<i64: 16, 128>}]} {
    %c0 = arith.constant 0 : index
    %0 = memref.load %arg2[%c0] : memref<1xf32, #tpu.memory_space<smem>>
    %c0_0 = arith.constant 0 : index
    %c0_1 = arith.constant 0 : index
    %1 = vector.load %arg3[%c0_0, %c0_1] : memref<16x128xf32, #tpu.memory_space<vmem>>, vector<16x128xf32>
    %2 = vector.broadcast %0 : f32 to vector<16x128xf32>
    %3 = arith.mulf %1, %2 : vector<16x128xf32>
    %c0_2 = arith.constant 0 : index
    %c0_3 = arith.constant 0 : index
    %4 = vector.load %arg4[%c0_2, %c0_3] : memref<16x128xf32, #tpu.memory_space<vmem>>, vector<16x128xf32>
    tpu.vector_store %arg4[%c0_2, %c0_3], %3 {strides = array<i32>} : memref<16x128xf32, #tpu.memory_space<vmem>>, vector<16x128xf32>,
    return
  }
  func.func @transform_0(%arg0: i32, %arg1: i32, %arg2: memref<1xf32, #tpu.memory_space<smem>>) -> (i32, i32) {
    %c0_i32 = arith.constant 0 : i32
    return %arg0, %arg1 : i32, i32
  }
  func.func @transform_1(%arg0: i32, %arg1: i32, %arg2: memref<1xf32, #tpu.memory_space<smem>>) -> (i32, i32) {
    %c0_i32 = arith.constant 0 : i32
    return %arg0, %arg1 : i32, i32
  }
}

</mosaic_0001>

<bundles_post_ra>
// kernel: tpu_custom_call.1
= control target key start
LH: loop header
LB: loop body
LE: loop exit
PB: predicated region body
PF: predicated region fallthrough
CT: control target
= control target key end

     0   :  { %8 = vsyncpa [#allocation5], 0  ;;  %s154_s0 = inlined_call_operand.<no memory space> [shape: f32[1], index: 0, kind: input, shape index: {}]   ;;  %s155_s1 = inlined_call_operand.hbm [shape: f32[16,128], index: 1, kind: input, shape index: {}]   ;;  %s156_s2 = inlined_call_operand.hbm [shape: f32[16,128], index: 2, kind: output, shape index: {}]  }
   0x1   :  { %9 = vsyncpa [#allocation6], 0  ;;  %s102_s9 = smov [#allocation4]   ;;  %s54_s13 = scalar_lea.hbm %s155_s1, 256 }
   0x2   :  { %s15_s10 = sshll.u32 %s102_s9, 4  ;;  %p55_p0 = scmp.ne.s32.totalorder %s155_s1, %s54_s13  ;;  %s16_s10 = int_to_ptr.vmem [resolvable:$true] %s15_s10 }
   0x3   :  { %p58_p1 = scmp.lt.u32.totalorder %s54_s13, %s155_s1 }
   0x5   :  { %p60_p2 = pnand %p58_p1, %p55_p0 }
   0x7   :  { %63 = shalt.err (!%p60_p2)
}
   0x8   :  { %s64_s18 = scalar_lea.vmem %s16_s10, 256  ;;  %p69_p4 = scmp.lt.s32.totalorder %s16_s10, %s16_s10 }
   0x9   :  { %p65_p3 = scmp.ne.s32.totalorder %s16_s10, %s64_s18  ;;  %p70_p5 = scmp.lt.s32.totalorder %s64_s18, %s64_s18 }
   0xb   :  { %p71_p6 = por %p70_p5, %p69_p4 }
   0xd   :  { %p72_p7 = pnand %p71_p6, %p65_p3 }
   0xf   :  { %75 = shalt.err (!%p72_p7)
}
  0x10   :  { %s103_s19 = smov 128   ;;  %s104_s20 = smov 8  }
  0x11   :  { %21 = dma.hbm_to_vmem [thread:$0]  %s155_s1, 256, %s16_s10, [#allocation5], %s103_s19, %s103_s19, %s104_s20  }
  0x12   :  { %98 = dma.done.wait [#allocation5], 256  }
  0x13   :  { %99 = vsyncadd [#allocation5], 4294967040  ;;  %v28_v0 = vstv %s154_s0  ;;  %s105_s25 = smov [#allocation7]   ;;  %v26_v1 = vld [vmem:[#allocation4] sm:$0xff]  ;;  %v27_v2 = vld [vmem:[#allocation4 + $0x8] sm:$0xff] }
  0x14   :  { %s38_s26 = sshll.u32 %s105_s25, 4  ;;  %v29_v3 = vmul.f32 %v28_v0, %v26_v1  ;;  %v30_v4 = vmul.f32 %v28_v0, %v27_v2  ;;  %s39_s26 = int_to_ptr.vmem [resolvable:$true] %s38_s26 }
  0x15   :  { %s76_s27 = scalar_lea.vmem %s39_s26, 256  ;;  %p81_p9 = scmp.lt.s32.totalorder %s39_s26, %s39_s26 }
  0x16   :  { %31 = vst [vmem:[#allocation7] sm:$0xff] %v29_v3  ;;  %32 = vst [vmem:[#allocation7 + $0x8] sm:$0xff] %v30_v4  ;;  %p77_p8 = scmp.ne.s32.totalorder %s39_s26, %s76_s27  ;;  %p82_p10 = scmp.lt.s32.totalorder %s76_s27, %s76_s27 }
  0x18   :  { %p83_p11 = por %p82_p10, %p81_p9 }
  0x1a   :  { %p84_p12 = pnand %p83_p11, %p77_p8 }
  0x1c   :  { %87 = shalt.err (!%p84_p12)
}
  0x1d   :  { %s88_s0 = scalar_lea.hbm %s156_s2, 256 }
  0x1e   :  { %p89_p13 = scmp.ne.s32.totalorder %s156_s2, %s88_s0  ;;  %p92_p0 = scmp.lt.u32.totalorder %s88_s0, %s156_s2 }
  0x20   :  { %p94_p1 = pnand %p92_p0, %p89_p13 }
  0x22   :  { %97 = shalt.err (!%p94_p1)
}
  0x23   :  { %44 = dma.vmem_to_hbm [thread:$0]  %s39_s26, 256, %s156_s2, [#allocation6], %s103_s19, %s103_s19, %s104_s20  }
  0x24   :  { %100 = dma.done.wait [#allocation6], 256  }
  0x25   :  { %101 = vsyncadd [#allocation6], 4294967040 }
  0x26   :  { %48 = vsyncpa [#allocation5], 1 }
  0x27   :  { %49 = vsyncpa [#allocation6], 1 }

</bundles_post_ra>
